<compile_context>
chip_gen: v7x
topology: tpu7x:2x2x1
jax: 0.10.0
libtpu: 0.0.40
codegen_flags: <defaults>
</compile_context>

<pallas_src>
import functools

import jax
import jax.numpy as jnp
from jax.experimental import pallas as pl
from jax.experimental.pallas import tpu as pltpu

N_HEAD = 4
DK = 32                 # per-head dim (fixed in the PyTorch module)
H = N_HEAD * DK         # 128


def attn_layer_kernel(x_ref, wqkv_ref, wfc_ref, gamma_ref, beta_ref, o_ref, *, batch, seq):
    """Single grid step: fused QKV projection, per-head attention (batched over B),
    accumulated output projection, residual add and LayerNorm, all resident in VMEM."""
    x = x_ref[...].astype(jnp.float32)                                    # (N, D), N = B*L

    # One wide MXU matmul for all of Q, K, V (one weight push instead of three).
    qkv = jnp.dot(x, wqkv_ref[...], preferred_element_type=jnp.float32)  # (N, 3H)

    # Fold the 1/sqrt(dk) scale into q (few full vregs) instead of the score tiles.
    scale = jnp.float32(1.0) / jnp.sqrt(jnp.float32(DK))
    q = qkv[:, 0 * H:1 * H] * scale                                       # (N, H) vreg-aligned slice
    k = qkv[:, 1 * H:2 * H]                                               # (N, H)
    v = qkv[:, 2 * H:3 * H]                                               # (N, H)

    wfc = wfc_ref[...]                                                    # (H, D)

    out = jnp.zeros((batch * seq, x.shape[-1]), dtype=jnp.float32)        # (N, D) accumulator
    for h in range(N_HEAD):                                               # static unroll over heads
        # Per-head (N, DK) lane slices, reshaped to (B, L, DK); the leading split is layout-free.
        qh = q[:, h * DK:(h + 1) * DK].reshape(batch, seq, DK)
        kh = k[:, h * DK:(h + 1) * DK].reshape(batch, seq, DK)
        vh = v[:, h * DK:(h + 1) * DK].reshape(batch, seq, DK)

        s = jnp.einsum("bqd,bkd->bqk", qh, kh,
                       preferred_element_type=jnp.float32)                # (B, L, L)
        s = s - jnp.max(s, axis=-1, keepdims=True)
        e = jnp.exp(s)
        p = e * pl.reciprocal(jnp.sum(e, axis=-1, keepdims=True), approx=True)
        ctx = jnp.einsum("bqk,bkd->bqd", p, vh,
                         preferred_element_type=jnp.float32)              # (B, L, DK)

        # Project this head's context through its slice of fc and accumulate
        # (replaces the lane-concatenate of all heads + one big matmul).
        out = out + jnp.dot(ctx.reshape(batch * seq, DK),
                            wfc[h * DK:(h + 1) * DK, :],
                            preferred_element_type=jnp.float32)           # (N, D)

    y = out + x                                                           # residual

    # LayerNorm over last dim (biased variance, eps=1e-5, like nn.LayerNorm defaults)
    mean = jnp.mean(y, axis=-1, keepdims=True)
    var = jnp.mean((y - mean) ** 2, axis=-1, keepdims=True)
    y_norm = (y - mean) * jax.lax.rsqrt(var + 1e-5)
    o_ref[...] = (y_norm * gamma_ref[...] + beta_ref[...]).astype(o_ref.dtype)


def attention_layer(x, wq, wk, wv, wfc, gamma, beta):
    B, L, D = x.shape
    N = B * L
    # Layout plumbing in the wrapper: fuse the QKV weights and flatten the activations
    # to a lane-dense 2-D slab. Both are free row-major reshapes at the HBM level
    # (the concat is a one-time weight prep).
    wqkv = jnp.concatenate([wq, wk, wv], axis=1)        # (D, 3H)
    x2 = x.reshape(N, D)

    out2 = pl.pallas_call(
        functools.partial(attn_layer_kernel, batch=B, seq=L),
        out_shape=jax.ShapeDtypeStruct((N, D), x.dtype),
        grid=(1,),                                      # single step: everything fits VMEM
        in_specs=[
            pl.BlockSpec((N, D), lambda i: (0, 0)),      # x (flattened)
            pl.BlockSpec((D, 3 * H), lambda i: (0, 0)),  # fused [W_Q | W_K | W_V]^T
            pl.BlockSpec((H, D), lambda i: (0, 0)),      # fc^T
            pl.BlockSpec((1, D), lambda i: (0, 0)),      # LayerNorm gamma
            pl.BlockSpec((1, D), lambda i: (0, 0)),      # LayerNorm beta
        ],
        out_specs=pl.BlockSpec((N, D), lambda i: (0, 0)),
        compiler_params=pltpu.CompilerParams(dimension_semantics=("arbitrary",)),
    )(x2, wqkv, wfc, gamma, beta)
    return out2.reshape(B, L, D)


def reference(x, wq, wk, wv, wfc, gamma, beta):
    """Pure-JAX reference matching the PyTorch forward."""
    B, L, D = x.shape
    q = (x @ wq).reshape(B, L, N_HEAD, DK).transpose(0, 2, 1, 3)
    k = (x @ wk).reshape(B, L, N_HEAD, DK).transpose(0, 2, 1, 3)
    v = (x @ wv).reshape(B, L, N_HEAD, DK).transpose(0, 2, 1, 3)
    scores = jnp.einsum("bhqd,bhkd->bhqk", q, k) / jnp.sqrt(jnp.float32(DK))
    attn = jax.nn.softmax(scores, axis=-1)
    ctx = jnp.einsum("bhqk,bhkd->bhqd", attn, v)
    ctx = ctx.transpose(0, 2, 1, 3).reshape(B, L, N_HEAD * DK)
    out = ctx @ wfc + x
    mean = jnp.mean(out, axis=-1, keepdims=True)
    var = jnp.mean((out - mean) ** 2, axis=-1, keepdims=True)
    return (out - mean) * jax.lax.rsqrt(var + 1e-5) * gamma[0] + beta[0]


if __name__ == "__main__":
    # d_model=128 keeps every pallas_call-boundary slab lane-dense (128-lane multiples),
    # which removes all masked partial stores. dk=32 / n_head=4 are fixed by the module.
    d_model = 128
    B, L = 2, 8

    key = jax.random.PRNGKey(0)
    kx, kq, kk, kv, kf = jax.random.split(key, 5)

    x = jax.random.normal(kx, (B, L, d_model), dtype=jnp.float32)
    # Deterministic synthetic weights (stored as [in, out], i.e. PyTorch W^T)
    wq = jax.random.normal(kq, (d_model, H), dtype=jnp.float32) * 0.05
    wk = jax.random.normal(kk, (d_model, H), dtype=jnp.float32) * 0.05
    wv = jax.random.normal(kv, (d_model, H), dtype=jnp.float32) * 0.05
    wfc = jax.random.normal(kf, (H, d_model), dtype=jnp.float32) * 0.05
    gamma = jnp.ones((1, d_model), dtype=jnp.float32)   # nn.LayerNorm default weight
    beta = jnp.zeros((1, d_model), dtype=jnp.float32)   # nn.LayerNorm default bias

    out = attention_layer(x, wq, wk, wv, wfc, gamma, beta)
    out = jax.block_until_ready(out)

    ref = reference(x, wq, wk, wv, wfc, gamma, beta)
    assert out.shape == (B, L, d_model)
    # Tolerance loosened slightly for the approx (EUP) reciprocal in the softmax denominator.
    assert jnp.allclose(out, ref, atol=5e-3, rtol=5e-3), "mismatch vs reference"
    print("KERNEL_OK")
</pallas_src>

<mosaic_0001>
module attributes {stable_mosaic.version = 11 : i64} {
  func.func @attn_layer_kernel(%arg0: i32, %arg1: memref<16x128xf32, #tpu.memory_space<vmem>>, %arg2: memref<128x384xf32, #tpu.memory_space<vmem>>, %arg3: memref<128x128xf32, #tpu.memory_space<vmem>>, %arg4: memref<1x128xf32, #tpu.memory_space<vmem>>, %arg5: memref<1x128xf32, #tpu.memory_space<vmem>>, %arg6: memref<16x128xf32, #tpu.memory_space<vmem>>) attributes {dimension_semantics = [#tpu.dimension_semantics<arbitrary>], iteration_bounds = array<i64: 1>, scalar_prefetch = 0 : i64, scratch_operands = 0 : i64, tpu.core_type = #tpu.core_type<tc>, window_params = [{pipeline_mode = #tpu.pipeline_mode<synchronous>, transform_indices = @transform_0, window_bounds = array<i64: 16, 128>}, {pipeline_mode = #tpu.pipeline_mode<synchronous>, transform_indices = @transform_1, window_bounds = array<i64: 128, 384>}, {pipeline_mode = #tpu.pipeline_mode<synchronous>, transform_indices = @transform_2, window_bounds = array<i64: 128, 128>}, {pipeline_mode = #tpu.pipeline_mode<synchronous>, transform_indices = @transform_3, window_bounds = array<i64: 1, 128>}, {pipeline_mode = #tpu.pipeline_mode<synchronous>, transform_indices = @transform_4, window_bounds = array<i64: 1, 128>}, {pipeline_mode = #tpu.pipeline_mode<synchronous>, transform_indices = @transform_5, window_bounds = array<i64: 16, 128>}]} {
    %c0 = arith.constant 0 : index
    %c0_0 = arith.constant 0 : index
    %0 = vector.load %arg1[%c0, %c0_0] : memref<16x128xf32, #tpu.memory_space<vmem>>, vector<16x128xf32>
    %c0_1 = arith.constant 0 : index
    %c0_2 = arith.constant 0 : index
    %1 = vector.load %arg2[%c0_1, %c0_2] : memref<128x384xf32, #tpu.memory_space<vmem>>, vector<128x384xf32>
    %cst = arith.constant dense<0.000000e+00> : vector<16x384xf32>
    %2 = tpu.matmul %0, %1, %cst {dimension_numbers = #tpu.dot_dimension_numbers<[1], [0], [0], [1], [0, 0, 1, 1], [], []>} : vector<16x128xf32>, vector<128x384xf32>, vector<16x384xf32> -> vector<16x384xf32>
    %cst_3 = arith.constant 3.200000e+01 : f32
    %3 = math.sqrt %cst_3 : f32
    %cst_4 = arith.constant 1.000000e+00 : f32
    %4 = arith.divf %cst_4, %3 : f32
    %5 = vector.extract_strided_slice %2 {offsets = [0, 0], sizes = [16, 128], strides = [1, 1]} : vector<16x384xf32> to vector<16x128xf32>
    %6 = vector.broadcast %4 : f32 to vector<16x128xf32>
    %7 = arith.mulf %5, %6 : vector<16x128xf32>
    %8 = vector.extract_strided_slice %2 {offsets = [0, 128], sizes = [16, 128], strides = [1, 1]} : vector<16x384xf32> to vector<16x128xf32>
    %9 = vector.extract_strided_slice %2 {offsets = [0, 256], sizes = [16, 128], strides = [1, 1]} : vector<16x384xf32> to vector<16x128xf32>
    %c0_5 = arith.constant 0 : index
    %c0_6 = arith.constant 0 : index
    %10 = vector.load %arg3[%c0_5, %c0_6] : memref<128x128xf32, #tpu.memory_space<vmem>>, vector<128x128xf32>
    %cst_7 = arith.constant 0.000000e+00 : f32
    %11 = vector.broadcast %cst_7 : f32 to vector<16x128xf32>
    %12 = vector.extract_strided_slice %7 {offsets = [0, 0], sizes = [16, 32], strides = [1, 1]} : vector<16x128xf32> to vector<16x32xf32>
    %13 = vector.shape_cast %12 : vector<16x32xf32> to vector<2x8x32xf32>
    %14 = vector.extract_strided_slice %8 {offsets = [0, 0], sizes = [16, 32], strides = [1, 1]} : vector<16x128xf32> to vector<16x32xf32>
    %15 = vector.shape_cast %14 : vector<16x32xf32> to vector<2x8x32xf32>
    %16 = vector.extract_strided_slice %9 {offsets = [0, 0], sizes = [16, 32], strides = [1, 1]} : vector<16x128xf32> to vector<16x32xf32>
    %17 = vector.shape_cast %16 : vector<16x32xf32> to vector<2x8x32xf32>
    "tpu.trace_start"() <{level = 10 : i32, message = "bqd,bkd->bqk"}> : () -> ()
    %cst_8 = arith.constant dense<0.000000e+00> : vector<2x8x8xf32>
    %18 = tpu.matmul %13, %15, %cst_8 {dimension_numbers = #tpu.dot_dimension_numbers<[2], [2], [1], [1], [0, 0, 0, 1, 1, 1], [0], [0]>} : vector<2x8x32xf32>, vector<2x8x32xf32>, vector<2x8x8xf32> -> vector<2x8x8xf32>
    "tpu.trace_stop"() : () -> ()
    %cst_9 = arith.constant dense<0xFF800000> : vector<2x8xf32>
    %19 = vector.multi_reduction <maximumf>, %18, %cst_9 [2] : vector<2x8x8xf32> to vector<2x8xf32>
    %20 = vector.shape_cast %19 : vector<2x8xf32> to vector<2x8x1xf32>
    %21 = vector.broadcast %20 : vector<2x8x1xf32> to vector<2x8x8xf32>
    %22 = arith.subf %18, %21 : vector<2x8x8xf32>
    %23 = math.exp %22 : vector<2x8x8xf32>
    %cst_10 = arith.constant dense<0.000000e+00> : vector<2x8xf32>
    %24 = vector.multi_reduction <add>, %23, %cst_10 [2] : vector<2x8x8xf32> to vector<2x8xf32>
    %25 = vector.shape_cast %24 : vector<2x8xf32> to vector<2x8x1xf32>
    %26 = tpu.reciprocal %25 {approx = true} : vector<2x8x1xf32> -> vector<2x8x1xf32>
    %27 = vector.broadcast %26 : vector<2x8x1xf32> to vector<2x8x8xf32>
    %28 = arith.mulf %23, %27 : vector<2x8x8xf32>
    "tpu.trace_start"() <{level = 10 : i32, message = "bqk,bkd->bqd"}> : () -> ()
    %cst_11 = arith.constant dense<0.000000e+00> : vector<2x8x32xf32>
    %29 = tpu.matmul %28, %17, %cst_11 {dimension_numbers = #tpu.dot_dimension_numbers<[2], [1], [1], [2], [0, 0, 0, 1, 1, 2], [0], [0]>} : vector<2x8x8xf32>, vector<2x8x32xf32>, vector<2x8x32xf32> -> vector<2x8x32xf32>
    "tpu.trace_stop"() : () -> ()
    %30 = vector.shape_cast %29 : vector<2x8x32xf32> to vector<16x32xf32>
    %31 = vector.extract_strided_slice %10 {offsets = [0, 0], sizes = [32, 128], strides = [1, 1]} : vector<128x128xf32> to vector<32x128xf32>
    %cst_12 = arith.constant dense<0.000000e+00> : vector<16x128xf32>
    %32 = tpu.matmul %30, %31, %cst_12 {dimension_numbers = #tpu.dot_dimension_numbers<[1], [0], [0], [1], [0, 0, 1, 1], [], []>} : vector<16x32xf32>, vector<32x128xf32>, vector<16x128xf32> -> vector<16x128xf32>
    %33 = arith.addf %11, %32 : vector<16x128xf32>
    %34 = vector.extract_strided_slice %7 {offsets = [0, 32], sizes = [16, 32], strides = [1, 1]} : vector<16x128xf32> to vector<16x32xf32>
    %35 = vector.shape_cast %34 : vector<16x32xf32> to vector<2x8x32xf32>
    %36 = vector.extract_strided_slice %8 {offsets = [0, 32], sizes = [16, 32], strides = [1, 1]} : vector<16x128xf32> to vector<16x32xf32>
    %37 = vector.shape_cast %36 : vector<16x32xf32> to vector<2x8x32xf32>
    %38 = vector.extract_strided_slice %9 {offsets = [0, 32], sizes = [16, 32], strides = [1, 1]} : vector<16x128xf32> to vector<16x32xf32>
    %39 = vector.shape_cast %38 : vector<16x32xf32> to vector<2x8x32xf32>
    "tpu.trace_start"() <{level = 10 : i32, message = "bqd,bkd->bqk"}> : () -> ()
    %cst_13 = arith.constant dense<0.000000e+00> : vector<2x8x8xf32>
    %40 = tpu.matmul %35, %37, %cst_13 {dimension_numbers = #tpu.dot_dimension_numbers<[2], [2], [1], [1], [0, 0, 0, 1, 1, 1], [0], [0]>} : vector<2x8x32xf32>, vector<2x8x32xf32>, vector<2x8x8xf32> -> vector<2x8x8xf32>
    "tpu.trace_stop"() : () -> ()
    %cst_14 = arith.constant dense<0xFF800000> : vector<2x8xf32>
    %41 = vector.multi_reduction <maximumf>, %40, %cst_14 [2] : vector<2x8x8xf32> to vector<2x8xf32>
    %42 = vector.shape_cast %41 : vector<2x8xf32> to vector<2x8x1xf32>
    %43 = vector.broadcast %42 : vector<2x8x1xf32> to vector<2x8x8xf32>
    %44 = arith.subf %40, %43 : vector<2x8x8xf32>
    %45 = math.exp %44 : vector<2x8x8xf32>
    %cst_15 = arith.constant dense<0.000000e+00> : vector<2x8xf32>
    %46 = vector.multi_reduction <add>, %45, %cst_15 [2] : vector<2x8x8xf32> to vector<2x8xf32>
    %47 = vector.shape_cast %46 : vector<2x8xf32> to vector<2x8x1xf32>
    %48 = tpu.reciprocal %47 {approx = true} : vector<2x8x1xf32> -> vector<2x8x1xf32>
    %49 = vector.broadcast %48 : vector<2x8x1xf32> to vector<2x8x8xf32>
    %50 = arith.mulf %45, %49 : vector<2x8x8xf32>
    "tpu.trace_start"() <{level = 10 : i32, message = "bqk,bkd->bqd"}> : () -> ()
    %cst_16 = arith.constant dense<0.000000e+00> : vector<2x8x32xf32>
    %51 = tpu.matmul %50, %39, %cst_16 {dimension_numbers = #tpu.dot_dimension_numbers<[2], [1], [1], [2], [0, 0, 0, 1, 1, 2], [0], [0]>} : vector<2x8x8xf32>, vector<2x8x32xf32>, vector<2x8x32xf32> -> vector<2x8x32xf32>
    "tpu.trace_stop"() : () -> ()
    %52 = vector.shape_cast %51 : vector<2x8x32xf32> to vector<16x32xf32>
    %53 = vector.extract_strided_slice %10 {offsets = [32, 0], sizes = [32, 128], strides = [1, 1]} : vector<128x128xf32> to vector<32x128xf32>
    %cst_17 = arith.constant dense<0.000000e+00> : vector<16x128xf32>
    %54 = tpu.matmul %52, %53, %cst_17 {dimension_numbers = #tpu.dot_dimension_numbers<[1], [0], [0], [1], [0, 0, 1, 1], [], []>} : vector<16x32xf32>, vector<32x128xf32>, vector<16x128xf32> -> vector<16x128xf32>
    %55 = arith.addf %33, %54 : vector<16x128xf32>
    %56 = vector.extract_strided_slice %7 {offsets = [0, 64], sizes = [16, 32], strides = [1, 1]} : vector<16x128xf32> to vector<16x32xf32>
    %57 = vector.shape_cast %56 : vector<16x32xf32> to vector<2x8x32xf32>
    %58 = vector.extract_strided_slice %8 {offsets = [0, 64], sizes = [16, 32], strides = [1, 1]} : vector<16x128xf32> to vector<16x32xf32>
    %59 = vector.shape_cast %58 : vector<16x32xf32> to vector<2x8x32xf32>
    %60 = vector.extract_strided_slice %9 {offsets = [0, 64], sizes = [16, 32], strides = [1, 1]} : vector<16x128xf32> to vector<16x32xf32>
    %61 = vector.shape_cast %60 : vector<16x32xf32> to vector<2x8x32xf32>
    "tpu.trace_start"() <{level = 10 : i32, message = "bqd,bkd->bqk"}> : () -> ()
    %cst_18 = arith.constant dense<0.000000e+00> : vector<2x8x8xf32>
    %62 = tpu.matmul %57, %59, %cst_18 {dimension_numbers = #tpu.dot_dimension_numbers<[2], [2], [1], [1], [0, 0, 0, 1, 1, 1], [0], [0]>} : vector<2x8x32xf32>, vector<2x8x32xf32>, vector<2x8x8xf32> -> vector<2x8x8xf32>
    "tpu.trace_stop"() : () -> ()
    %cst_19 = arith.constant dense<0xFF800000> : vector<2x8xf32>
    %63 = vector.multi_reduction <maximumf>, %62, %cst_19 [2] : vector<2x8x8xf32> to vector<2x8xf32>
    %64 = vector.shape_cast %63 : vector<2x8xf32> to vector<2x8x1xf32>
    %65 = vector.broadcast %64 : vector<2x8x1xf32> to vector<2x8x8xf32>
    %66 = arith.subf %62, %65 : vector<2x8x8xf32>
    %67 = math.exp %66 : vector<2x8x8xf32>
    %cst_20 = arith.constant dense<0.000000e+00> : vector<2x8xf32>
    %68 = vector.multi_reduction <add>, %67, %cst_20 [2] : vector<2x8x8xf32> to vector<2x8xf32>
    %69 = vector.shape_cast %68 : vector<2x8xf32> to vector<2x8x1xf32>
    %70 = tpu.reciprocal %69 {approx = true} : vector<2x8x1xf32> -> vector<2x8x1xf32>
    %71 = vector.broadcast %70 : vector<2x8x1xf32> to vector<2x8x8xf32>
    %72 = arith.mulf %67, %71 : vector<2x8x8xf32>
    "tpu.trace_start"() <{level = 10 : i32, message = "bqk,bkd->bqd"}> : () -> ()
    %cst_21 = arith.constant dense<0.000000e+00> : vector<2x8x32xf32>
    %73 = tpu.matmul %72, %61, %cst_21 {dimension_numbers = #tpu.dot_dimension_numbers<[2], [1], [1], [2], [0, 0, 0, 1, 1, 2], [0], [0]>} : vector<2x8x8xf32>, vector<2x8x32xf32>, vector<2x8x32xf32> -> vector<2x8x32xf32>
    "tpu.trace_stop"() : () -> ()
    %74 = vector.shape_cast %73 : vector<2x8x32xf32> to vector<16x32xf32>
    %75 = vector.extract_strided_slice %10 {offsets = [64, 0], sizes = [32, 128], strides = [1, 1]} : vector<128x128xf32> to vector<32x128xf32>
    %cst_22 = arith.constant dense<0.000000e+00> : vector<16x128xf32>
    %76 = tpu.matmul %74, %75, %cst_22 {dimension_numbers = #tpu.dot_dimension_numbers<[1], [0], [0], [1], [0, 0, 1, 1], [], []>} : vector<16x32xf32>, vector<32x128xf32>, vector<16x128xf32> -> vector<16x128xf32>
    %77 = arith.addf %55, %76 : vector<16x128xf32>
    %78 = vector.extract_strided_slice %7 {offsets = [0, 96], sizes = [16, 32], strides = [1, 1]} : vector<16x128xf32> to vector<16x32xf32>
    %79 = vector.shape_cast %78 : vector<16x32xf32> to vector<2x8x32xf32>
    %80 = vector.extract_strided_slice %8 {offsets = [0, 96], sizes = [16, 32], strides = [1, 1]} : vector<16x128xf32> to vector<16x32xf32>
    %81 = vector.shape_cast %80 : vector<16x32xf32> to vector<2x8x32xf32>
    %82 = vector.extract_strided_slice %9 {offsets = [0, 96], sizes = [16, 32], strides = [1, 1]} : vector<16x128xf32> to vector<16x32xf32>
    %83 = vector.shape_cast %82 : vector<16x32xf32> to vector<2x8x32xf32>
    "tpu.trace_start"() <{level = 10 : i32, message = "bqd,bkd->bqk"}> : () -> ()
    %cst_23 = arith.constant dense<0.000000e+00> : vector<2x8x8xf32>
    %84 = tpu.matmul %79, %81, %cst_23 {dimension_numbers = #tpu.dot_dimension_numbers<[2], [2], [1], [1], [0, 0, 0, 1, 1, 1], [0], [0]>} : vector<2x8x32xf32>, vector<2x8x32xf32>, vector<2x8x8xf32> -> vector<2x8x8xf32>
    "tpu.trace_stop"() : () -> ()
    %cst_24 = arith.constant dense<0xFF800000> : vector<2x8xf32>
    %85 = vector.multi_reduction <maximumf>, %84, %cst_24 [2] : vector<2x8x8xf32> to vector<2x8xf32>
    %86 = vector.shape_cast %85 : vector<2x8xf32> to vector<2x8x1xf32>
    %87 = vector.broadcast %86 : vector<2x8x1xf32> to vector<2x8x8xf32>
    %88 = arith.subf %84, %87 : vector<2x8x8xf32>
    %89 = math.exp %88 : vector<2x8x8xf32>
    %cst_25 = arith.constant dense<0.000000e+00> : vector<2x8xf32>
    %90 = vector.multi_reduction <add>, %89, %cst_25 [2] : vector<2x8x8xf32> to vector<2x8xf32>
    %91 = vector.shape_cast %90 : vector<2x8xf32> to vector<2x8x1xf32>
    %92 = tpu.reciprocal %91 {approx = true} : vector<2x8x1xf32> -> vector<2x8x1xf32>
    %93 = vector.broadcast %92 : vector<2x8x1xf32> to vector<2x8x8xf32>
    %94 = arith.mulf %89, %93 : vector<2x8x8xf32>
    "tpu.trace_start"() <{level = 10 : i32, message = "bqk,bkd->bqd"}> : () -> ()
    %cst_26 = arith.constant dense<0.000000e+00> : vector<2x8x32xf32>
    %95 = tpu.matmul %94, %83, %cst_26 {dimension_numbers = #tpu.dot_dimension_numbers<[2], [1], [1], [2], [0, 0, 0, 1, 1, 2], [0], [0]>} : vector<2x8x8xf32>, vector<2x8x32xf32>, vector<2x8x32xf32> -> vector<2x8x32xf32>
    "tpu.trace_stop"() : () -> ()
    %96 = vector.shape_cast %95 : vector<2x8x32xf32> to vector<16x32xf32>
    %97 = vector.extract_strided_slice %10 {offsets = [96, 0], sizes = [32, 128], strides = [1, 1]} : vector<128x128xf32> to vector<32x128xf32>
    %cst_27 = arith.constant dense<0.000000e+00> : vector<16x128xf32>
    %98 = tpu.matmul %96, %97, %cst_27 {dimension_numbers = #tpu.dot_dimension_numbers<[1], [0], [0], [1], [0, 0, 1, 1], [], []>} : vector<16x32xf32>, vector<32x128xf32>, vector<16x128xf32> -> vector<16x128xf32>
    %99 = arith.addf %77, %98 : vector<16x128xf32>
    %100 = arith.addf %99, %0 : vector<16x128xf32>
    %cst_28 = arith.constant dense<0.000000e+00> : vector<16xf32>
    %101 = vector.multi_reduction <add>, %100, %cst_28 [1] : vector<16x128xf32> to vector<16xf32>
    %102 = vector.shape_cast %101 : vector<16xf32> to vector<16x1xf32>
    %cst_29 = arith.constant 1.280000e+02 : f32
    %103 = vector.broadcast %cst_29 : f32 to vector<16x1xf32>
    %104 = arith.divf %102, %103 : vector<16x1xf32>
    %105 = vector.broadcast %104 : vector<16x1xf32> to vector<16x128xf32>
    %106 = arith.subf %100, %105 : vector<16x128xf32>
    %107 = arith.mulf %106, %106 : vector<16x128xf32>
    %cst_30 = arith.constant dense<0.000000e+00> : vector<16xf32>
    %108 = vector.multi_reduction <add>, %107, %cst_30 [1] : vector<16x128xf32> to vector<16xf32>
    %109 = vector.shape_cast %108 : vector<16xf32> to vector<16x1xf32>
    %cst_31 = arith.constant 1.280000e+02 : f32
    %110 = vector.broadcast %cst_31 : f32 to vector<16x1xf32>
    %111 = arith.divf %109, %110 : vector<16x1xf32>
    %112 = vector.broadcast %104 : vector<16x1xf32> to vector<16x128xf32>
    %113 = arith.subf %100, %112 : vector<16x128xf32>
    %cst_32 = arith.constant 9.99999974E-6 : f32
    %114 = vector.broadcast %cst_32 : f32 to vector<16x1xf32>
    %115 = arith.addf %111, %114 : vector<16x1xf32>
    %116 = math.rsqrt %115 : vector<16x1xf32>
    %117 = vector.broadcast %116 : vector<16x1xf32> to vector<16x128xf32>
    %118 = arith.mulf %113, %117 : vector<16x128xf32>
    %c0_33 = arith.constant 0 : index
    %c0_34 = arith.constant 0 : index
    %119 = vector.load %arg4[%c0_33, %c0_34] : memref<1x128xf32, #tpu.memory_space<vmem>>, vector<1x128xf32>
    %120 = vector.broadcast %119 : vector<1x128xf32> to vector<16x128xf32>
    %121 = arith.mulf %118, %120 : vector<16x128xf32>
    %c0_35 = arith.constant 0 : index
    %c0_36 = arith.constant 0 : index
    %122 = vector.load %arg5[%c0_35, %c0_36] : memref<1x128xf32, #tpu.memory_space<vmem>>, vector<1x128xf32>
    %123 = vector.broadcast %122 : vector<1x128xf32> to vector<16x128xf32>
    %124 = arith.addf %121, %123 : vector<16x128xf32>
    %c0_37 = arith.constant 0 : index
    %c0_38 = arith.constant 0 : index
    %125 = vector.load %arg6[%c0_37, %c0_38] : memref<16x128xf32, #tpu.memory_space<vmem>>, vector<16x128xf32>
    tpu.vector_store %arg6[%c0_37, %c0_38], %124 {strides = array<i32>} : memref<16x128xf32, #tpu.memory_space<vmem>>, vector<16x128xf32>,
    return
  }
  func.func @transform_0(%arg0: i32) -> (i32, i32) {
    %c0_i32 = arith.constant 0 : i32
    %c0_i32_0 = arith.constant 0 : i32
    %c0_i32_1 = arith.constant 0 : i32
    return %c0_i32, %c0_i32_0 : i32, i32
  }
  func.func @transform_1(%arg0: i32) -> (i32, i32) {
    %c0_i32 = arith.constant 0 : i32
    %c0_i32_0 = arith.constant 0 : i32
    %c0_i32_1 = arith.constant 0 : i32
    return %c0_i32, %c0_i32_0 : i32, i32
  }
  func.func @transform_2(%arg0: i32) -> (i32, i32) {
    %c0_i32 = arith.constant 0 : i32
    %c0_i32_0 = arith.constant 0 : i32
    %c0_i32_1 = arith.constant 0 : i32
    return %c0_i32, %c0_i32_0 : i32, i32
  }
  func.func @transform_3(%arg0: i32) -> (i32, i32) {
    %c0_i32 = arith.constant 0 : i32
    %c0_i32_0 = arith.constant 0 : i32
    %c0_i32_1 = arith.constant 0 : i32
    return %c0_i32, %c0_i32_0 : i32, i32
  }
  func.func @transform_4(%arg0: i32) -> (i32, i32) {
    %c0_i32 = arith.constant 0 : i32
    %c0_i32_0 = arith.constant 0 : i32
    %c0_i32_1 = arith.constant 0 : i32
    return %c0_i32, %c0_i32_0 : i32, i32
  }
  func.func @transform_5(%arg0: i32) -> (i32, i32) {
    %c0_i32 = arith.constant 0 : i32
    %c0_i32_0 = arith.constant 0 : i32
    %c0_i32_1 = arith.constant 0 : i32
    return %c0_i32, %c0_i32_0 : i32, i32
  }
}

</mosaic_0001>

<bundles_post_ra>
// kernel: tpu_custom_call.1
= control target key start
LH: loop header
LB: loop body
LE: loop exit
PB: predicated region body
PF: predicated region fallthrough
CT: control target
= control target key end

     0   :  { %10 = vsyncpa [#allocation3], 0  ;;  %s2776_s0 = inlined_call_operand.hbm [shape: f32[16,128], index: 0, kind: input, shape index: {}]   ;;  %s2777_s1 = inlined_call_operand.hbm [shape: f32[128,384], index: 1, kind: input, shape index: {}]   ;;  %s2778_s2 = inlined_call_operand.hbm [shape: f32[128,128], index: 2, kind: input, shape index: {}]   ;;  %s2779_s3 = inlined_call_operand.vmem [shape: f32[1,128], index: 3, kind: input, shape index: {}]   ;;  %s2780_s4 = inlined_call_operand.vmem [shape: f32[1,128], index: 4, kind: input, shape index: {}]   ;;  %s2781_s5 = inlined_call_operand.hbm [shape: f32[16,128], index: 5, kind: output, shape index: {}]  }
   0x1   :  { %11 = vsyncpa [#allocation6], 0 }
   0x2   :  { %12 = vsyncpa [#allocation4], 0  ;;  %s2499_s18 = smov [#allocation5]   ;;  %s2405_s22 = scalar_lea.hbm %s2777_s1, 6144 }
   0x3   :  { %s30_s19 = sshll.u32 %s2499_s18, 4  ;;  %p2406_p0 = scmp.ne.s32.totalorder %s2777_s1, %s2405_s22  ;;  %s31_s19 = int_to_ptr.vmem [resolvable:$true] %s30_s19 }
   0x4   :  { %p2409_p1 = scmp.lt.u32.totalorder %s2405_s22, %s2777_s1 }
   0x6   :  { %p2411_p2 = pnand %p2409_p1, %p2406_p0 }
   0x8   :  { %2414 = shalt.err (!%p2411_p2)
}
   0x9   :  { %s2415_s27 = scalar_lea.vmem %s31_s19, 6144  ;;  %p2420_p4 = scmp.lt.s32.totalorder %s31_s19, %s31_s19 }
   0xa   :  { %p2416_p3 = scmp.ne.s32.totalorder %s31_s19, %s2415_s27  ;;  %p2421_p5 = scmp.lt.s32.totalorder %s2415_s27, %s2415_s27 }
   0xc   :  { %p2422_p6 = por %p2421_p5, %p2420_p4 }
   0xe   :  { %p2423_p7 = pnand %p2422_p6, %p2416_p3 }
  0x10   :  { %2426 = shalt.err (!%p2423_p7)
}
  0x11   :  { %s2500_s28 = smov 384   ;;  %s2501_s29 = smov 24  }
  0x12   :  { %36 = dma.hbm_to_vmem [thread:$0]  %s2777_s1, 6144, %s31_s19, [#allocation6], %s2500_s28, %s2500_s28, %s2501_s29  }
  0x13   :  { %s2502_s7 = smov [#allocation2]   ;;  %s2427_s11 = scalar_lea.hbm %s2776_s0, 256 }
  0x14   :  { %s18_s8 = sshll.u32 %s2502_s7, 4  ;;  %p2428_p8 = scmp.ne.s32.totalorder %s2776_s0, %s2427_s11  ;;  %s19_s8 = int_to_ptr.vmem [resolvable:$true] %s18_s8 }
  0x15   :  { %p2431_p9 = scmp.lt.u32.totalorder %s2427_s11, %s2776_s0 }
  0x17   :  { %p2433_p10 = pnand %p2431_p9, %p2428_p8 }
  0x19   :  { %2436 = shalt.err (!%p2433_p10)
}
  0x1a   :  { %s2437_s16 = scalar_lea.vmem %s19_s8, 256  ;;  %p2442_p12 = scmp.lt.s32.totalorder %s19_s8, %s19_s8 }
  0x1b   :  { %p2438_p11 = scmp.ne.s32.totalorder %s19_s8, %s2437_s16  ;;  %p2443_p13 = scmp.lt.s32.totalorder %s2437_s16, %s2437_s16 }
  0x1d   :  { %p2444_p0 = por %p2443_p13, %p2442_p12 }
  0x1f   :  { %p2445_p1 = pnand %p2444_p0, %p2438_p11 }
  0x21   :  { %2448 = shalt.err (!%p2445_p1)
}
  0x22   :  { %s2503_s1 = smov 128   ;;  %s2504_s17 = smov 8  }
  0x23   :  { %24 = dma.hbm_to_vmem [thread:$0]  %s2776_s0, 256, %s19_s8, [#allocation3], %s2503_s1, %s2503_s1, %s2504_s17  }
  0x24   :  { %s2505_s20 = smov [#allocation7]   ;;  %s2449_s24 = scalar_lea.hbm %s2778_s2, 2048 }
  0x25   :  { %s42_s21 = sshll.u32 %s2505_s20, 4  ;;  %p2450_p2 = scmp.ne.s32.totalorder %s2778_s2, %s2449_s24  ;;  %s43_s21 = int_to_ptr.vmem [resolvable:$true] %s42_s21 }
  0x26   :  { %p2453_p3 = scmp.lt.u32.totalorder %s2449_s24, %s2778_s2 }
  0x28   :  { %p2455_p4 = pnand %p2453_p3, %p2450_p2 }
  0x2a   :  { %2458 = shalt.err (!%p2455_p4)
}
  0x2b   :  { %s2459_s29 = scalar_lea.vmem %s43_s21, 2048  ;;  %p2464_p6 = scmp.lt.s32.totalorder %s43_s21, %s43_s21 }
  0x2c   :  { %p2460_p5 = scmp.ne.s32.totalorder %s43_s21, %s2459_s29  ;;  %p2465_p7 = scmp.lt.s32.totalorder %s2459_s29, %s2459_s29 }
  0x2e   :  { %p2466_p8 = por %p2465_p7, %p2464_p6 }
  0x30   :  { %p2467_p9 = pnand %p2466_p8, %p2460_p5 }
  0x32   :  { %2470 = shalt.err (!%p2467_p9)
}
  0x33   :  { %48 = dma.hbm_to_vmem [thread:$0]  %s2778_s2, 2048, %s43_s21, [#allocation6], %s2503_s1, %s2503_s1, %s2504_s17  }
  0x34   :  { %2493 = dma.done.wait [#allocation3], 256  }
  0x35   :  { %2494 = vsyncadd [#allocation3], 4294967040 }
  0x36   :  { %2495 = dma.done.wait [#allocation6], 8192  }
  0x37   :  { %2496 = vsyncadd [#allocation6], 4294959104  ;;  %v2506_v0 = vmov 0.0   ;;  %v65_v1 = vld [vmem:[#allocation5 + $0x8] sm:$0xff]  ;;  %v68_v2 = vld [vmem:[#allocation5 + $0x20] sm:$0xff]  ;;  %vm2507_vm0 = vmmov 0  }
  0x38   :  { %176 = vmatprep.mubr.f32.mxu0 %v2506_v0  ;;  %v64_v3 = vld [vmem:[#allocation5] sm:$0xff]  ;;  %v2254_v4 = vpack.c.bf16 %v68_v2, %v65_v1  ;;  %v67_v5 = vld [vmem:[#allocation5 + $0x18] sm:$0xff]  ;;  %v74_v7 = vld [vmem:[#allocation5 + $0x50] sm:$0xff]  ;;  %vm282_vm1 = vcmask 261120   ;;  %s2508_s2 = smov 96   ;;  %vm435_vm2 = vcmask 64512  }
  0x39   :  { %v71_v6 = vld [vmem:[#allocation5 + $0x38] sm:$0xff]  ;;  %v2256_v8 = vpack.c.bf16 %v67_v5, %v64_v3  ;;  %v70_v10 = vld [vmem:[#allocation5 + $0x30] sm:$0xff]  ;;  %v73_v11 = vld [vmem:[#allocation5 + $0x48] sm:$0xff]  ;;  %s2509_s6 = smov 64   ;;  %s2510_s7 = smov 32  }
  0x3a   :  { %v2258_v9 = vpack.c.bf16 %v74_v7, %v71_v6  ;;  %v77_v12 = vld [vmem:[#allocation5 + $0x68] sm:$0xff]  ;;  %2255 = vmatprep.subr.bf16.mxu0 %v2254_v4  ;;  %v80_v13 = vld [vmem:[#allocation5 + $0x80] sm:$0xff]  ;;  %v2260_v14 = vpack.c.bf16 %v73_v11, %v70_v10  ;;  %v79_v17 = vld [vmem:[#allocation5 + $0x78] sm:$0xff]  ;;  %s2511_s12 = smov [#allocation8]  }
  0x3b   :  { %2257 = vmatpush1.bf16.msra.mxu0 %v2256_v8  ;;  %v2262_v15 = vpack.c.bf16 %v80_v13, %v77_v12  ;;  %v76_v16 = vld [vmem:[#allocation5 + $0x60] sm:$0xff]  ;;  %v83_v18 = vld [vmem:[#allocation5 + $0x98] sm:$0xff]  ;;  %v86_v19 = vld [vmem:[#allocation5 + $0xb0] sm:$0xff]  ;;  %s1974_s13 = sshll.u32 %s2511_s12, 4  ;;  %s1975_s13 = int_to_ptr.vmem [resolvable:$true] %s1974_s13 }
  0x3c   :  { %2259 = vmatprep.subr.bf16.mxu0 %v2258_v9  ;;  %v2264_v20 = vpack.c.bf16 %v79_v17, %v76_v16  ;;  %v2266_v21 = vpack.c.bf16 %v86_v19, %v83_v18  ;;  %v82_v22 = vld [vmem:[#allocation5 + $0x90] sm:$0xff]  ;;  %v85_v23 = vld [vmem:[#allocation5 + $0xa8] sm:$0xff]  ;;  %v92_v25 = vld [vmem:[#allocation5 + $0xe0] sm:$0xff]  ;;  %s2471_s14 = scalar_lea.vmem %s1975_s13, 256  ;;  %p2476_p11 = scmp.lt.s32.totalorder %s1975_s13, %s1975_s13 }
  0x3d   :  { %v89_v24 = vld [vmem:[#allocation5 + $0xc8] sm:$0xff]  ;;  %v2585_v26 = vld [vmem:[#allocation2] sm:$0xff]  ;;  %v2268_v29 = vpack.c.bf16 %v85_v23, %v82_v22  ;;  %v88_v30 = vld [vmem:[#allocation5 + $0xc0] sm:$0xff]  ;;  %p2472_p10 = scmp.ne.s32.totalorder %s1975_s13, %s2471_s14  ;;  %p2477_p12 = scmp.lt.s32.totalorder %s2471_s14, %s2471_s14 }
  0x3e   :  { %v66_v27 = vld [vmem:[#allocation5 + $0x10] sm:$0xff]  ;;  %v69_v28 = vld [vmem:[#allocation5 + $0x28] sm:$0xff]  ;;  %2127 = vmatprep.mubr.f32.mxu1 %v2585_v26  ;;  %v72_v32 = vld [vmem:[#allocation5 + $0x40] sm:$0xff]  ;;  %v2270_v34 = vpack.c.bf16 %v92_v25, %v89_v24 }
  0x3f   :  { %2261 = vmatpush1.bf16.msra.mxu0 %v2260_v14  ;;  %v2286_v31 = vpack.c.bf16 %v69_v28, %v66_v27  ;;  %v75_v33 = vld [vmem:[#allocation5 + $0x58] sm:$0xff]  ;;  %v78_v37 = vld [vmem:[#allocation5 + $0x70] sm:$0xff]  ;;  %v81_v38 = vld [vmem:[#allocation5 + $0x88] sm:$0xff]  ;;  %p2478_p13 = por %p2477_p12, %p2476_p11 }
  0x40   :  { %2263 = vmatprep.subr.bf16.mxu0 %v2262_v15  ;;  %v91_v35 = vld [vmem:[#allocation5 + $0xd8] sm:$0xff]  ;;  %v2290_v36 = vpack.c.bf16 %v75_v33, %v72_v32  ;;  %v98_v40 = vld [vmem:[#allocation5 + $0x110] sm:$0xff]  ;;  %v2294_v43 = vpack.c.bf16 %v81_v38, %v78_v37  ;;  %v97_v45 = vld [vmem:[#allocation5 + $0x108] sm:$0xff] }
  0x41   :  { %v95_v39 = vld [vmem:[#allocation5 + $0xf8] sm:$0xff]  ;;  %2287 = vmatprep.subr.bf16.mxu1 %v2286_v31  ;;  %v2272_v41 = vpack.c.bf16 %v91_v35, %v88_v30  ;;  %v94_v42 = vld [vmem:[#allocation5 + $0xf0] sm:$0xff]  ;;  %v84_v46 = vld [vmem:[#allocation5 + $0xa0] sm:$0xff]  ;;  %p2479_p0 = pnand %p2478_p13, %p2472_p10 }
  0x42   :  { %2289 = vmatpush3.bf16.msra.mxu1 %v2286_v31  ;;  %v2274_v44 = vpack.c.bf16 %v98_v40, %v95_v39  ;;  %v87_v47 = vld [vmem:[#allocation5 + $0xb8] sm:$0xff]  ;;  %v101_v48 = vld [vmem:[#allocation5 + $0x128] sm:$0xff]  ;;  %v104_v49 = vld [vmem:[#allocation5 + $0x140] sm:$0xff]  ;;  %v2276_v50 = vpack.c.bf16 %v97_v45, %v94_v42 }
  0x43   :  { %2265 = vmatpush1.bf16.msra.mxu0 %v2264_v20  ;;  %2291 = vmatprep.subr.bf16.mxu1 %v2290_v36  ;;  %v100_v51 = vld [vmem:[#allocation5 + $0x120] sm:$0xff]  ;;  %v2298_v52 = vpack.c.bf16 %v87_v47, %v84_v46  ;;  %v2278_v53 = vpack.c.bf16 %v104_v49, %v101_v48  ;;  %v103_v54 = vld [vmem:[#allocation5 + $0x138] sm:$0xff]  ;;  %v90_v55 = vld [vmem:[#allocation5 + $0xd0] sm:$0xff] }
  0x44   :  { %2267 = vmatprep.subr.bf16.mxu0 %v2266_v21  ;;  %v93_v56 = vld [vmem:[#allocation5 + $0xe8] sm:$0xff]  ;;  %v107_v57 = vld [vmem:[#allocation5 + $0x158] sm:$0xff]  ;;  %v110_v58 = vld [vmem:[#allocation5 + $0x170] sm:$0xff]  ;;  %v2280_v59 = vpack.c.bf16 %v103_v54, %v100_v51 }
  0x45   :  { %v106_v60 = vld [vmem:[#allocation5 + $0x150] sm:$0xff]  ;;  %v2302_v61 = vpack.c.bf16 %v93_v56, %v90_v55  ;;  %v2282_v62 = vpack.c.bf16 %v110_v58, %v107_v57  ;;  %v109_v63 = vld [vmem:[#allocation5 + $0x168] sm:$0xff]  ;;  %v96_v1 = vld [vmem:[#allocation5 + $0x100] sm:$0xff] }
  0x46   :  { %2293 = vmatpush3.bf16.msra.mxu1 %v2290_v36  ;;  %v99_v2 = vld [vmem:[#allocation5 + $0x118] sm:$0xff]  ;;  %v2284_v3 = vpack.c.bf16 %v109_v63, %v106_v60  ;;  %v102_v5 = vld [vmem:[#allocation5 + $0x130] sm:$0xff]  ;;  %v105_v6 = vld [vmem:[#allocation5 + $0x148] sm:$0xff] }
  0x47   :  { %2269 = vmatpush1.bf16.msra.mxu0 %v2268_v29  ;;  %2295 = vmatprep.subr.bf16.mxu1 %v2294_v43  ;;  %v2306_v4 = vpack.c.bf16 %v99_v2, %v96_v1  ;;  %v2310_v7 = vpack.c.bf16 %v105_v6, %v102_v5  ;;  %v108_v8 = vld [vmem:[#allocation5 + $0x160] sm:$0xff]  ;;  %v111_v9 = vld [vmem:[#allocation5 + $0x178] sm:$0xff] }
  0x48   :  { %2271 = vmatprep.subr.bf16.mxu0 %v2270_v34  ;;  %v2591_v10 = vld [vmem:[#allocation2 + $0x8] sm:$0xff]  ;;  %v2314_v11 = vpack.c.bf16 %v111_v9, %v108_v8 }
  0x4a   :  { %2297 = vmatpush3.bf16.msra.mxu1 %v2294_v43 }
  0x4b   :  { %2273 = vmatpush1.bf16.msra.mxu0 %v2272_v41  ;;  %2299 = vmatprep.subr.bf16.mxu1 %v2298_v52 }
  0x4c   :  { %2275 = vmatprep.subr.bf16.mxu0 %v2274_v44 }
  0x4e   :  { %2301 = vmatpush3.bf16.msra.mxu1 %v2298_v52 }
  0x4f   :  { %2277 = vmatpush1.bf16.msra.mxu0 %v2276_v50  ;;  %2303 = vmatprep.subr.bf16.mxu1 %v2302_v61 }
  0x50   :  { %2279 = vmatprep.subr.bf16.mxu0 %v2278_v53 }
  0x52   :  { %2305 = vmatpush3.bf16.msra.mxu1 %v2302_v61 }
  0x53   :  { %2281 = vmatpush1.bf16.msra.mxu0 %v2280_v59  ;;  %2307 = vmatprep.subr.bf16.mxu1 %v2306_v4 }
  0x54   :  { %2283 = vmatprep.subr.bf16.mxu0 %v2282_v62 }
  0x56   :  { %2309 = vmatpush3.bf16.msra.mxu1 %v2306_v4 }
  0x57   :  { %2285 = vmatpush1.bf16.msra.mxu0 %v2284_v3  ;;  %2311 = vmatprep.subr.bf16.mxu1 %v2310_v7 }
  0x58   :  { %2135 = vmatprep.subr.mxu0 %v2506_v0 }
  0x5a   :  { %177 = vmatmul.mubr.f32.vlgmr.msra.gmra.mrb[0].mxu0 %v2585_v26  ;;  %2313 = vmatpush3.bf16.msra.mxu1 %v2310_v7 }
  0x5b   :  { %182 = vmatprep.mubr.f32.mxu0 %v2506_v0  ;;  %2315 = vmatprep.subr.bf16.mxu1 %v2314_v11 }
  0x5e   :  { %183 = vmatmul.mubr.f32.gmra.mrb[2].mxu0 %v2591_v10  ;;  %2317 = vmatpush3.bf16.msra.mxu1 %v2314_v11 }
  0x5f   :  { %2130 = vmatprep.subr.mxu1 %v2506_v0  ;;  %2137 = vmatprep.mubr.msk.f32.mxu0 %vm2507_vm0, %v2506_v0 }
  0x61   :  { %2128 = vmatmul.mubr.f32.vlgmr.msra.gmra.mrb[0].mxu1 %v2591_v10 }
  0x62   :  { %2132 = vmatprep.mubr.msk.f32.mxu1 %vm2507_vm0, %v2506_v0 }
 0x12d   :  { %v178_v12 = vpop.f32.mrb[0].mxu0 }
 0x12e   :  { %v2600_v13 = vpop.f32.mrb[1].mxu0  ;;  %v2604_v14 = vmul.f32 0.17677669, %v178_v12 }
 0x12f   :  { %2131 = vmatpush3.xpose.msk.msra.mxu1 %vm282_vm1, %v2600_v13 }
 0x130   :  { %2140 = vmatprep.subr.mxu1 %v2506_v0 }
 0x131   :  { %v184_v15 = vpop.f32.mrb[2].mxu0 }
 0x132   :  { %v2607_v16 = vpop.f32.mrb[3].mxu0  ;;  %2133 = vmatmul.mubr.msk.f32.vlgmr.msra.gmra.mrb[2].mxu1 %vm282_vm1, %v2604_v14  ;;  %v2615_v17 = vmul.f32 0.17677669, %v184_v15 }
 0x133   :  { %684 = vrot.lane.b32.xlu1 %v2607_v16, %s2508_s2  ;;  %2136 = vmatpush3.xpose.msk.msra.mxu0 %vm282_vm1, %v2607_v16 }
 0x134   :  { %2145 = vmatprep.subr.mxu0 %v2506_v0  ;;  %2142 = vmatprep.mubr.msk.f32.mxu1 %vm2507_vm0, %v2506_v0  ;;  %v2626_v18 = vpop.f32.mrb[0].mxu1 }
 0x135   :  { %v2628_v19 = vpop.f32.mrb[1].mxu1 }
 0x136   :  { %2138 = vmatmul.mubr.msk.f32.vlgmr.msra.gmra.mrb[4].mxu0 %vm282_vm1, %v2615_v17  ;;  %2141 = vmatpush3.msra.mxu1 %v2628_v19 }
 0x137   :  { %682 = vrot.lane.b32.xlu1 %v2615_v17, %s2508_s2  ;;  %2147 = vmatprep.mubr.msk.f32.mxu0 %vm2507_vm0, %v2506_v0 }
 0x138   :  { %2146 = vmatpush3.msra.mxu0 %v2626_v18  ;;  %2150 = vmatprep.subr.mxu1 %v2506_v0 }
 0x139   :  { %2155 = vmatprep.subr.mxu0 %v2506_v0 }
 0x1a5   :  { %v685_v33 = vpop.permute.xlu1 %684 }
 0x1a9   :  { %v683_v35 = vpop.permute.xlu1 %682 }
 0x205   :  { %v355_v20 = vpop.f32.mrb[2].mxu1 }
 0x206   :  { %v2134_v21 = vpop.f32.mrb[3].mxu1  ;;  %v436_v41 = vsel %vm435_vm2, %v355_v20, -inf }
 0x209   :  { %v431_v22 = vpop.f32.mrb[4].mxu0 }
 0x20a   :  { %v2139_v23 = vpop.f32.mrb[5].mxu0  ;;  %v439_v24 = vsel %vm435_vm2, %v431_v22, -inf }
 0x20b   :  { %440 = vmax.xlane.f32.xlu0 %v439_v24 }
 0x298   :  { %v441_v25 = vpop.xlane.xlu0 %440 }
 0x299   :  { %v443_v27 = vsub.f32 %v431_v22, %v441_v25 }
 0x29b   :  { %v446_v28 = vmul.f32 1.442695, %v443_v27 }
 0x29d   :  { %2369 = vpow2.f32 %v446_v28 }
 0x2a7   :  { %v2370_v29 = vpop.eup %2369 }
 0x2a8   :  { %v451_v30 = vsel %vm435_vm2, %v2370_v29, 0.0 }
 0x2a9   :  { %452 = vadd.xlane.f32.xlu0 %v451_v30 }
 0x336   :  { %v453_v31 = vpop.xlane.xlu0 %452 }
 0x337   :  { %2371 = vrcp.f32 %v453_v31 }
 0x341   :  { %v2372_v32 = vpop.eup %2371 }
 0x342   :  { %v457_v34 = vmul.f32 %v2372_v32, %v2370_v29 }
 0x344   :  { %2148 = vmatmul.mubr.msk.f32.vlgmr.msra.gmra.mrb[6].mxu0 %vm435_vm2, %v457_v34 }
 0x345   :  { %2156 = vmatpush3.xpose.msk.msra.mxu0 %vm282_vm1, %v685_v33  ;;  %2157 = vmatprep.mubr.msk.f32.mxu0 %vm2507_vm0, %v2506_v0 }
 0x346   :  { %2165 = vmatprep.subr.mxu0 %v2506_v0 }
 0x348   :  { %2158 = vmatmul.mubr.msk.f32.vlgmr.msra.gmra.mrb[8].mxu0 %vm282_vm1, %v683_v35 }
 0x349   :  { %2167 = vmatprep.mubr.msk.f32.mxu0 %vm2507_vm0, %v2506_v0 }
 0x417   :  { %v2644_v36 = vpop.f32.mrb[6].mxu0 }
 0x418   :  { %v2149_v37 = vpop.f32.mrb[7].mxu0 }
 0x41b   :  { %v756_v38 = vpop.f32.mrb[8].mxu0 }
 0x41c   :  { %v2159_v39 = vpop.f32.mrb[9].mxu0  ;;  %v763_v40 = vsel %vm435_vm2, %v756_v38, -inf }
 0x41d   :  { %764 = vmax.xlane.f32.xlu0 %v763_v40 }
 0x433   :  { %860 = vrot.lane.b32.xlu0 %v2626_v18, %s2508_s2 }
 0x437   :  { %1100 = vrot.lane.b32.xlu0 %v2600_v13, %s2509_s6 }
 0x43b   :  { %1098 = vrot.lane.b32.xlu0 %v2604_v14, %s2509_s6 }
 0x43f   :  { %1178 = vrot.lane.b32.xlu0 %v2607_v16, %s2509_s6 }
 0x45e   :  { %437 = vmax.xlane.f32.xlu0 %v436_v41 }
 0x474   :  { %606 = vrot.lane.b32.xlu0 %v2600_v13, %s2508_s2 }
 0x4aa   :  { %v765_v42 = vpop.xlane.xlu0 %764 }
 0x4ab   :  { %v767_v43 = vsub.f32 %v756_v38, %v765_v42 }
 0x4ad   :  { %v770_v44 = vmul.f32 1.442695, %v767_v43 }
 0x4ae   :  { %v861_v45 = vpop.permute.xlu0 %860 }
 0x4af   :  { %2373 = vpow2.f32 %v770_v44  ;;  %2166 = vmatpush3.msra.mxu0 %v861_v45 }
 0x4b0   :  { %2192 = vmatprep.subr.mxu0 %v2506_v0 }
 0x4b2   :  { %v1101_v48 = vpop.permute.xlu0 %1100 }
 0x4b6   :  { %v1099_v49 = vpop.permute.xlu0 %1098 }
 0x4b9   :  { %v2374_v46 = vpop.eup %2373 }
 0x4ba   :  { %v775_v47 = vsel %vm435_vm2, %v2374_v46, 0.0  ;;  %v1179_v50 = vpop.permute.xlu0 %1178 }
 0x4bb   :  { %776 = vadd.xlane.f32.xlu1 %v775_v47 }
 0x4cc   :  { %1176 = vrot.lane.b32.xlu1 %v2615_v17, %s2509_s6 }
 0x4eb   :  { %v438_v51 = vpop.xlane.xlu0 %437 }
 0x4ec   :  { %v442_v52 = vsub.f32 %v355_v20, %v438_v51  ;;  %v270_v51 = vld [vmem:[#allocation7 + $0x20] sm:$0xff] }
 0x4ee   :  { %v444_v53 = vmul.f32 1.442695, %v442_v52  ;;  %v271_v52 = vld [vmem:[#allocation7 + $0x28] sm:$0xff] }
 0x4ef   :  { %v607_v63 = vpop.permute.xlu0 %606 }
 0x4f0   :  { %2375 = vpow2.f32 %v444_v53  ;;  %v272_v53 = vld [vmem:[#allocation7 + $0x30] sm:$0xff] }
 0x4fa   :  { %v2376_v54 = vpop.eup %2375 }
 0x4fb   :  { %v448_v55 = vsel %vm435_vm2, %v2376_v54, 0.0 }
 0x4fc   :  { %449 = vadd.xlane.f32.xlu1 %v448_v55  ;;  %v273_v55 = vld [vmem:[#allocation7 + $0x38] sm:$0xff] }
 0x50d   :  { %604 = vrot.lane.b32.xlu1 %v2604_v14, %s2508_s2 }
 0x548   :  { %v777_v56 = vpop.xlane.xlu1 %776 }
 0x549   :  { %2377 = vrcp.f32 %v777_v56  ;;  %v2322_v56 = vpack.c.bf16 %v273_v55, %v272_v53 }
 0x54c   :  { %v1177_v59 = vpop.permute.xlu1 %1176 }
 0x553   :  { %v2378_v57 = vpop.eup %2377 }
 0x554   :  { %v781_v58 = vmul.f32 %v2378_v57, %v2374_v46  ;;  %v266_v57 = vld [vmem:[#allocation7] sm:$0xff] }
 0x556   :  { %2168 = vmatmul.mubr.msk.f32.vlgmr.msra.gmra.mrb[10].mxu0 %vm435_vm2, %v781_v58  ;;  %v267_v58 = vld [vmem:[#allocation7 + $0x8] sm:$0xff] }
 0x557   :  { %2193 = vmatpush3.xpose.msk.msra.mxu0 %vm282_vm1, %v1101_v48  ;;  %2194 = vmatprep.mubr.msk.f32.mxu0 %vm2507_vm0, %v2506_v0 }
 0x558   :  { %2197 = vmatprep.subr.mxu0 %v2506_v0 }
 0x55a   :  { %2195 = vmatmul.mubr.msk.f32.vlgmr.msra.gmra.mrb[12].mxu0 %vm282_vm1, %v1099_v49 }
 0x55b   :  { %2198 = vmatpush3.xpose.msk.msra.mxu0 %vm282_vm1, %v1179_v50  ;;  %2199 = vmatprep.mubr.msk.f32.mxu0 %vm2507_vm0, %v2506_v0 }
 0x55c   :  { %2202 = vmatprep.subr.mxu0 %v2506_v0 }
 0x55e   :  { %2200 = vmatmul.mubr.msk.f32.vlgmr.msra.gmra.mrb[14].mxu0 %vm282_vm1, %v1177_v59  ;;  %v2326_v59 = vpack.c.bf16 %v267_v58, %v266_v57 }
 0x55f   :  { %2204 = vmatprep.mubr.msk.f32.mxu0 %vm2507_vm0, %v2506_v0 }
 0x589   :  { %v450_v60 = vpop.xlane.xlu1 %449 }
 0x58a   :  { %2379 = vrcp.f32 %v450_v60 }
 0x58d   :  { %v605_v1 = vpop.permute.xlu1 %604 }
 0x594   :  { %v2380_v61 = vpop.eup %2379 }
 0x595   :  { %v456_v62 = vmul.f32 %v2380_v61, %v2376_v54  ;;  %v2318_v54 = vpack.c.bf16 %v271_v52, %v270_v51 }
 0x597   :  { %2143 = vmatmul.mubr.msk.f32.vlgmr.msra.gmra.mrb[4].mxu1 %vm435_vm2, %v456_v62 }
 0x598   :  { %2151 = vmatpush3.xpose.msk.msra.mxu1 %vm282_vm1, %v607_v63  ;;  %2152 = vmatprep.mubr.msk.f32.mxu1 %vm2507_vm0, %v2506_v0 }
 0x599   :  { %2160 = vmatprep.subr.mxu1 %v2506_v0 }
 0x59b   :  { %2153 = vmatmul.mubr.msk.f32.vlgmr.msra.gmra.mrb[6].mxu1 %vm282_vm1, %v605_v1 }
 0x59c   :  { %2162 = vmatprep.mubr.msk.f32.mxu1 %vm2507_vm0, %v2506_v0 }
 0x629   :  { %v2686_v2 = vpop.f32.mrb[10].mxu0 }
 0x62a   :  { %v2169_v3 = vpop.f32.mrb[11].mxu0 }
 0x62d   :  { %v1172_v4 = vpop.f32.mrb[12].mxu0 }
 0x62e   :  { %v2196_v5 = vpop.f32.mrb[13].mxu0  ;;  %v1254_v6 = vsel %vm435_vm2, %v1172_v4, -inf }
 0x62f   :  { %1255 = vmax.xlane.f32.xlu0 %v1254_v6 }
 0x631   :  { %v1250_v7 = vpop.f32.mrb[14].mxu0 }
 0x632   :  { %v2201_v8 = vpop.f32.mrb[15].mxu0  ;;  %v1257_v9 = vsel %vm435_vm2, %v1250_v7, -inf }
 0x633   :  { %1258 = vmax.xlane.f32.xlu1 %v1257_v9  ;;  %v268_v8 = vld [vmem:[#allocation7 + $0x10] sm:$0xff]  ;;  %v269_v9 = vld [vmem:[#allocation7 + $0x18] sm:$0xff] }
 0x644   :  { %1352 = vrot.lane.b32.xlu1 %v2626_v18, %s2509_s6 }
 0x645   :  { %1276 = vrot.lane.b32.xlu0 %v2628_v19, %s2509_s6 }
 0x648   :  { %1591 = vrot.lane.b32.xlu1 %v2607_v16, %s2510_s7 }
 0x66a   :  { %v2696_v11 = vpop.f32.mrb[4].mxu1 }
 0x66b   :  { %v2144_v12 = vpop.f32.mrb[5].mxu1 }
 0x66e   :  { %v678_v15 = vpop.f32.mrb[6].mxu1 }
 0x66f   :  { %v2154_v20 = vpop.f32.mrb[7].mxu1  ;;  %v760_v21 = vsel %vm435_vm2, %v678_v15, -inf }
 0x670   :  { %761 = vmax.xlane.f32.xlu1 %v760_v21  ;;  %v274_v21 = vld [vmem:[#allocation7 + $0x40] sm:$0xff] }
 0x6bc   :  { %v1256_v22 = vpop.xlane.xlu0 %1255 }
 0x6bd   :  { %v1260_v23 = vsub.f32 %v1172_v4, %v1256_v22  ;;  %v275_v22 = vld [vmem:[#allocation7 + $0x48] sm:$0xff] }
 0x6bf   :  { %v1262_v24 = vmul.f32 1.442695, %v1260_v23  ;;  %v2334_v23 = vpack.c.bf16 %v275_v22, %v274_v21 }
 0x6c0   :  { %v1277_v25 = vpop.permute.xlu0 %1276  ;;  %v1259_v16 = vpop.xlane.xlu1 %1258 }
 0x6c1   :  { %2381 = vpow2.f32 %v1262_v24  ;;  %2203 = vmatpush3.msra.mxu0 %v1277_v25  ;;  %v1261_v29 = vsub.f32 %v1250_v7, %v1259_v16  ;;  %v276_v24 = vld [vmem:[#allocation7 + $0x50] sm:$0xff]  ;;  %v277_v25 = vld [vmem:[#allocation7 + $0x58] sm:$0xff] }
 0x6c2   :  { %2207 = vmatprep.subr.mxu0 %v2506_v0 }
 0x6c3   :  { %v1264_v30 = vmul.f32 1.442695, %v1261_v29 }
 0x6c4   :  { %v1353_v33 = vpop.permute.xlu1 %1352 }
 0x6c5   :  { %2383 = vpow2.f32 %v1264_v30 }
 0x6c8   :  { %v1592_v34 = vpop.permute.xlu1 %1591 }
 0x6cb   :  { %v2382_v27 = vpop.eup %2381 }
 0x6cc   :  { %v1266_v28 = vsel %vm435_vm2, %v2382_v27, 0.0 }
 0x6cd   :  { %1267 = vadd.xlane.f32.xlu0 %v1266_v28 }
 0x6cf   :  { %v2384_v31 = vpop.eup %2383 }
 0x6d0   :  { %v1269_v32 = vsel %vm435_vm2, %v2384_v31, 0.0 }
 0x6e3   :  { %1513 = vrot.lane.b32.xlu0 %v2600_v13, %s2510_s7 }
 0x6fd   :  { %v762_v35 = vpop.xlane.xlu1 %761 }
 0x6fe   :  { %v766_v37 = vsub.f32 %v678_v15, %v762_v35  ;;  %v2330_v15 = vpack.c.bf16 %v269_v9, %v268_v8  ;;  %v279_v35 = vld [vmem:[#allocation7 + $0x68] sm:$0xff] }
 0x700   :  { %v768_v38 = vmul.f32 1.442695, %v766_v37 }
 0x702   :  { %1270 = vadd.xlane.f32.xlu0 %v1269_v32  ;;  %2385 = vpow2.f32 %v768_v38 }
 0x70c   :  { %v2386_v13 = vpop.eup %2385 }
 0x70d   :  { %v772_v39 = vsel %vm435_vm2, %v2386_v13, 0.0 }
 0x718   :  { %1511 = vrot.lane.b32.xlu0 %v2604_v14, %s2510_s7 }
 0x71c   :  { %1589 = vrot.lane.b32.xlu0 %v2615_v17, %s2510_s7 }
 0x73b   :  { %773 = vadd.xlane.f32.xlu0 %v772_v39 }
 0x751   :  { %783 = vrot.lane.b32.xlu0 %v2628_v19, %s2508_s2 }
 0x755   :  { %1765 = vrot.lane.b32.xlu0 %v2626_v18, %s2510_s7 }
 0x75a   :  { %v1268_v40 = vpop.xlane.xlu0 %1267 }
 0x75b   :  { %2387 = vrcp.f32 %v1268_v40 }
 0x75e   :  { %v1514_v17 = vpop.permute.xlu0 %1513 }
 0x765   :  { %v2388_v14 = vpop.eup %2387 }
 0x766   :  { %v1274_v41 = vmul.f32 %v2388_v14, %v2382_v27  ;;  %v2338_v27 = vpack.c.bf16 %v277_v25, %v276_v24 }
 0x768   :  { %2205 = vmatmul.mubr.msk.f32.vlgmr.msra.gmra.mrb[16].mxu0 %vm435_vm2, %v1274_v41 }
 0x769   :  { %2208 = vmatpush3.msra.mxu0 %v1353_v33  ;;  %2209 = vmatprep.mubr.msk.f32.mxu0 %vm2507_vm0, %v2506_v0 }
 0x76a   :  { %2223 = vmatprep.subr.mxu0 %v2506_v0 }
 0x78f   :  { %v1271_v42 = vpop.xlane.xlu0 %1270 }
 0x790   :  { %2389 = vrcp.f32 %v1271_v42 }
 0x793   :  { %v1512_v18 = vpop.permute.xlu0 %1511 }
 0x797   :  { %v1590_v45 = vpop.permute.xlu0 %1589 }
 0x79a   :  { %v2390_v43 = vpop.eup %2389 }
 0x79b   :  { %v1275_v44 = vmul.f32 %v2390_v43, %v2384_v31 }
 0x79d   :  { %2210 = vmatmul.mubr.msk.f32.vlgmr.msra.gmra.mrb[18].mxu0 %vm435_vm2, %v1275_v44 }
 0x79e   :  { %2224 = vmatpush3.xpose.msk.msra.mxu0 %vm282_vm1, %v1514_v17  ;;  %2225 = vmatprep.mubr.msk.f32.mxu0 %vm2507_vm0, %v2506_v0  ;;  %v281_v17 = vld [vmem:[#allocation7 + $0x78] sm:$0xff] }
 0x79f   :  { %2228 = vmatprep.subr.mxu0 %v2506_v0 }
 0x7a1   :  { %2226 = vmatmul.mubr.msk.f32.vlgmr.msra.gmra.mrb[20].mxu0 %vm282_vm1, %v1512_v18 }
 0x7a2   :  { %2229 = vmatpush3.xpose.msk.msra.mxu0 %vm282_vm1, %v1592_v34  ;;  %2230 = vmatprep.mubr.msk.f32.mxu0 %vm2507_vm0, %v2506_v0  ;;  %v278_v34 = vld [vmem:[#allocation7 + $0x60] sm:$0xff] }
 0x7a3   :  { %2238 = vmatprep.subr.mxu0 %v2506_v0  ;;  %v2342_v38 = vpack.c.bf16 %v279_v35, %v278_v34 }
 0x7a5   :  { %2231 = vmatmul.mubr.msk.f32.vlgmr.msra.gmra.mrb[22].mxu0 %vm282_vm1, %v1590_v45 }
 0x7a6   :  { %2240 = vmatprep.mubr.msk.f32.mxu0 %vm2507_vm0, %v2506_v0 }
 0x7c8   :  { %v774_v46 = vpop.xlane.xlu0 %773 }
 0x7c9   :  { %2391 = vrcp.f32 %v774_v46 }
 0x7cc   :  { %v784_v47 = vpop.permute.xlu0 %783 }
 0x7cd   :  { %2161 = vmatpush3.msra.mxu1 %v784_v47 }
 0x7ce   :  { %2319 = vmatprep.subr.bf16.mxu1 %v2318_v54 }
 0x7d0   :  { %v1766_v48 = vpop.permute.xlu0 %1765 }
 0x7d1   :  { %2239 = vmatpush3.msra.mxu0 %v1766_v48 }
 0x7d3   :  { %v2392_v49 = vpop.eup %2391 }
 0x7d4   :  { %v780_v50 = vmul.f32 %v2392_v49, %v2386_v13 }
 0x7d6   :  { %2163 = vmatmul.mubr.msk.f32.vlgmr.msra.gmra.mrb[8].mxu1 %vm435_vm2, %v780_v50 }
 0x7d7   :  { %2321 = vmatpush3.bf16.msra.mxu1 %v2318_v54 }
 0x7d8   :  { %2323 = vmatprep.subr.bf16.mxu1 %v2322_v56 }
 0x7db   :  { %2325 = vmatpush3.bf16.msra.mxu1 %v2322_v56 }
 0x7dc   :  { %2327 = vmatprep.subr.bf16.mxu1 %v2326_v59 }
 0x83b   :  { %v1348_v60 = vpop.f32.mrb[16].mxu0 }
 0x83c   :  { %v2206_v61 = vpop.f32.mrb[17].mxu0 }
 0x870   :  { %v1424_v62 = vpop.f32.mrb[18].mxu0 }
 0x871   :  { %v2211_v63 = vpop.f32.mrb[19].mxu0 }
 0x872   :  { %v2019_v63 = vld [vmem:[%s2779_s3] ss:$0 sm:$0xff] }
 0x874   :  { %v1585_v1 = vpop.f32.mrb[20].mxu0 }
 0x875   :  { %v2227_v3 = vpop.f32.mrb[21].mxu0  ;;  %v1667_v4 = vsel %vm435_vm2, %v1585_v1, -inf }
 0x876   :  { %1668 = vmax.xlane.f32.xlu1 %v1667_v4  ;;  %v2020_v3 = vld [vmem:[%s2780_s4] ss:$0 sm:$0xff] }
 0x878   :  { %v1663_v5 = vpop.f32.mrb[22].mxu0 }
 0x879   :  { %v2232_v6 = vpop.f32.mrb[23].mxu0  ;;  %v1670_v7 = vsel %vm435_vm2, %v1663_v5, -inf }
 0x87a   :  { %1671 = vmax.xlane.f32.xlu1 %v1670_v7 }
 0x8a9   :  { %v855_v12 = vpop.f32.mrb[8].mxu1 }
 0x8aa   :  { %v2164_v20 = vpop.f32.mrb[9].mxu1  ;;  %2178 = vmatprep.mubr.msk.f32.mxu1 %vm282_vm1, %v855_v12 }
 0x8ab   :  { %2179 = vmatmul.mubr.msk.f32.vlgmr.msra.gmra.mrb[10].mxu1 %vm282_vm1, %v2686_v2 }
 0x8ac   :  { %2329 = vmatpush3.bf16.msra.mxu1 %v2326_v59  ;;  %2189 = vmatprep.mubr.msk.f32.mxu1 %vm282_vm1, %v2696_v11 }
 0x8ad   :  { %2331 = vmatprep.subr.bf16.mxu1 %v2330_v15 }
 0x8b0   :  { %2333 = vmatpush3.bf16.msra.mxu1 %v2330_v15 }
 0x8b1   :  { %2335 = vmatprep.subr.bf16.mxu1 %v2334_v23 }
 0x8b3   :  { %2190 = vmatmul.mubr.msk.f32.vlgmr.msra.gmra.mrb[10].mxu1 %vm282_vm1, %v2644_v36 }
 0x8b4   :  { %2337 = vmatpush3.bf16.msra.mxu1 %v2334_v23  ;;  %2220 = vmatprep.mubr.msk.f32.mxu1 %vm282_vm1, %v1348_v60 }
 0x8b5   :  { %2339 = vmatprep.subr.bf16.mxu1 %v2338_v27 }
 0x8b8   :  { %2341 = vmatpush3.bf16.msra.mxu1 %v2338_v27 }
 0x8b9   :  { %2233 = vmatprep.subr.mxu1 %v2506_v0 }
 0x8bb   :  { %2221 = vmatmul.mubr.msk.f32.vlgmr.msra.gmra.mrb[10].mxu1 %vm282_vm1, %v1424_v62 }
 0x8bc   :  { %2235 = vmatprep.mubr.msk.f32.mxu1 %vm2507_vm0, %v2506_v0 }
 0x903   :  { %v1669_v2 = vpop.xlane.xlu1 %1668 }
 0x904   :  { %v1673_v11 = vsub.f32 %v1585_v1, %v1669_v2 }
 0x906   :  { %v1675_v28 = vmul.f32 1.442695, %v1673_v11 }
 0x907   :  { %v1672_v16 = vpop.xlane.xlu1 %1671 }
 0x908   :  { %2393 = vpow2.f32 %v1675_v28  ;;  %v1674_v29 = vsub.f32 %v1663_v5, %v1672_v16 }
 0x90a   :  { %v1677_v30 = vmul.f32 1.442695, %v1674_v29 }
 0x90c   :  { %2395 = vpow2.f32 %v1677_v30 }
 0x912   :  { %v2394_v36 = vpop.eup %2393 }
 0x913   :  { %v1679_v31 = vsel %vm435_vm2, %v2394_v36, 0.0 }
 0x914   :  { %1680 = vadd.xlane.f32.xlu1 %v1679_v31 }
 0x916   :  { %v2396_v32 = vpop.eup %2395 }
 0x917   :  { %v1682_v33 = vsel %vm435_vm2, %v2396_v32, 0.0 }
 0x918   :  { %1683 = vadd.xlane.f32.xlu1 %v1682_v33 }
 0x929   :  { %1689 = vrot.lane.b32.xlu1 %v2628_v19, %s2510_s7  ;;  %v280_v19 = vld [vmem:[#allocation7 + $0x70] sm:$0xff] }
 0x92a   :  { %v2346_v42 = vpack.c.bf16 %v281_v17, %v280_v19 }
 0x9a1   :  { %v1681_v0 = vpop.xlane.xlu1 %1680 }
 0x9a2   :  { %2397 = vrcp.f32 %v1681_v0 }
 0x9a5   :  { %v1684_v37 = vpop.xlane.xlu1 %1683 }
 0x9a6   :  { %2399 = vrcp.f32 %v1684_v37 }
 0x9a9   :  { %v1690_v13 = vpop.permute.xlu1 %1689 }
 0x9aa   :  { %2234 = vmatpush3.msra.mxu1 %v1690_v13 }
 0x9ab   :  { %2343 = vmatprep.subr.bf16.mxu1 %v2342_v38 }
 0x9ac   :  { %v2398_v39 = vpop.eup %2397 }
 0x9ad   :  { %v1687_v40 = vmul.f32 %v2398_v39, %v2394_v36 }
 0x9af   :  { %2236 = vmatmul.mubr.msk.f32.vlgmr.msra.gmra.mrb[12].mxu1 %vm435_vm2, %v1687_v40 }
 0x9b0   :  { %v2400_v14 = vpop.eup %2399  ;;  %2345 = vmatpush3.bf16.msra.mxu1 %v2342_v38 }
 0x9b1   :  { %v1688_v41 = vmul.f32 %v2400_v14, %v2396_v32  ;;  %2347 = vmatprep.subr.bf16.mxu1 %v2346_v42 }
 0x9b3   :  { %2241 = vmatmul.mubr.msk.f32.vlgmr.msra.gmra.mrb[24].mxu0 %vm435_vm2, %v1688_v41 }
 0x9b4   :  { %2349 = vmatpush3.bf16.msra.mxu1 %v2346_v42 }
 0xa82   :  { %v1761_v43 = vpop.f32.mrb[12].mxu1 }
 0xa83   :  { %v2237_v44 = vpop.f32.mrb[13].mxu1  ;;  %2251 = vmatprep.mubr.msk.f32.mxu1 %vm282_vm1, %v1761_v43 }
 0xa86   :  { %v1837_v18 = vpop.f32.mrb[24].mxu0 }
 0xa87   :  { %v2242_v45 = vpop.f32.mrb[25].mxu0  ;;  %2252 = vmatmul.mubr.msk.f32.vlgmr.msra.gmra.mrb[10].mxu1 %vm282_vm1, %v1837_v18 }
 0xb5a   :  { %v2253_v46 = vpop.f32.mrb[10].mxu1 }
 0xb5b   :  { %v1925_v47 = vadd.f32 %v2253_v46, %v2591_v10  ;;  %v1913_v48 = vpop.f32.mrb[11].mxu1 }
 0xb5c   :  { %v1924_v49 = vadd.f32 %v1913_v48, %v2585_v26 }
 0xb5d   :  { %1928 = vadd.xlane.f32.xlu1 %v1925_v47 }
 0xb5e   :  { %1926 = vadd.xlane.f32.xlu0 %v1924_v49 }
 0xbea   :  { %v1929_v50 = vpop.xlane.xlu1 %1928 }
 0xbeb   :  { %v1927_v51 = vpop.xlane.xlu0 %1926  ;;  %v1932_v52 = vmul.f32 0.0078125, %v1929_v50 }
 0xbec   :  { %v1931_v53 = vmul.f32 0.0078125, %v1927_v51 }
 0xbed   :  { %v1934_v55 = vsub.f32 %v1925_v47, %v1932_v52 }
 0xbee   :  { %v1933_v54 = vsub.f32 %v1924_v49, %v1931_v53 }
 0xbef   :  { %v1936_v57 = vmul.f32 %v1934_v55, %v1934_v55 }
 0xbf0   :  { %v1935_v56 = vmul.f32 %v1933_v54, %v1933_v54 }
 0xbf2   :  { %1937 = vadd.xlane.f32.xlu0 %v1935_v56 }
 0xbf6   :  { %1939 = vadd.xlane.f32.xlu0 %v1936_v57 }
 0xc7f   :  { %v1938_v58 = vpop.xlane.xlu0 %1937 }
 0xc80   :  { %v1941_v59 = vmul.f32 0.0078125, %v1938_v58 }
 0xc82   :  { %v1943_v60 = vadd.f32 1e-05, %v1941_v59 }
 0xc83   :  { %v1940_v61 = vpop.xlane.xlu0 %1939 }
 0xc84   :  { %2401 = vrsqrt.f32 %v1943_v60  ;;  %v1942_v10 = vmul.f32 0.0078125, %v1940_v61 }
 0xc86   :  { %v1944_v62 = vadd.f32 1e-05, %v1942_v10 }
 0xc88   :  { %2403 = vrsqrt.f32 %v1944_v62 }
 0xc8e   :  { %v2402_v26 = vpop.eup %2401 }
 0xc8f   :  { %v1947_v1 = vmul.f32 %v2402_v26, %v1933_v54 }
 0xc91   :  { %v1956_v4 = vmul.f32 %v2019_v63, %v1947_v1 }
 0xc92   :  { %v2404_v5 = vpop.eup %2403 }
 0xc93   :  { %v1948_v6 = vmul.f32 %v2404_v5, %v1934_v55  ;;  %v1965_v7 = vadd.f32 %v2020_v3, %v1956_v4 }
 0xc95   :  { %v1957_v8 = vmul.f32 %v2019_v63, %v1948_v6  ;;  %1967 = vst [vmem:[#allocation8] sm:$0xff] %v1965_v7 }
 0xc97   :  { %v1966_v9 = vadd.f32 %v2020_v3, %v1957_v8 }
 0xc99   :  { %1968 = vst [vmem:[#allocation8 + $0x8] sm:$0xff] %v1966_v9 }
 0xc9a   :  { %2482 = shalt.err (!%p2479_p0)
}
 0xc9b   :  { %s2483_s15 = scalar_lea.hbm %s2781_s5, 256 }
 0xc9c   :  { %p2484_p1 = scmp.ne.s32.totalorder %s2781_s5, %s2483_s15  ;;  %p2487_p2 = scmp.lt.u32.totalorder %s2483_s15, %s2781_s5 }
 0xc9e   :  { %p2489_p3 = pnand %p2487_p2, %p2484_p1 }
 0xca0   :  { %2492 = shalt.err (!%p2489_p3)
}
 0xca1   :  { %1980 = dma.vmem_to_hbm [thread:$0]  %s1975_s13, 256, %s2781_s5, [#allocation4], %s2503_s1, %s2503_s1, %s2504_s17  }
 0xca2   :  { %2497 = dma.done.wait [#allocation4], 256  }
 0xca3   :  { %2498 = vsyncadd [#allocation4], 4294967040 }
 0xca4   :  { %1984 = vsyncpa [#allocation3], 1 }
 0xca5   :  { %1985 = vsyncpa [#allocation6], 1 }
 0xca6   :  { %1986 = vsyncpa [#allocation4], 1 }

</bundles_post_ra>
